<compile_context>
chip_gen: v7x
topology: tpu7x:2x2x1
jax: 0.10.0
libtpu: 0.0.40
codegen_flags: <defaults>
</compile_context>

<pallas_src>
import math

import jax
import jax.numpy as jnp
from jax.experimental import pallas as pl
from jax.experimental.pallas import tpu as pltpu


def _make_hbm_copy_kernel(rows_per_chunk):
    """Kernel: each grid step DMAs its contiguous row-slice HBM -> HBM."""

    def kernel(x_hbm, o_hbm, sem):
        i = pl.program_id(0)
        start = pl.multiple_of(i * rows_per_chunk, rows_per_chunk)
        cp = pltpu.make_async_copy(
            x_hbm.at[pl.ds(start, rows_per_chunk), :],
            o_hbm.at[pl.ds(start, rows_per_chunk), :],
            sem,
        )
        cp.start()
        cp.wait()

    return kernel


def flatten_layer(x, *, min_kernel_bytes=4 << 20, num_chunks=2):
    """Pallas equivalent of FlattenLayer.forward: x.view(x.shape[0], -1)."""
    b = x.shape[0]
    flat = math.prod(x.shape[1:]) if x.ndim > 1 else 1

    # The flatten itself: metadata-only reshape on a contiguous row-major array.
    x2 = x.reshape(b, flat)

    itemsize = jnp.dtype(x.dtype).itemsize
    nbytes = b * flat * itemsize

    # Early-exit (perf review): for small/standalone flattens, the reshape view
    # is already the answer — the kernel would be 100% fixed overhead.
    if nbytes == 0 or nbytes < min_kernel_bytes:
        return x2

    # Split the copy across a parallel grid so both v7x TensorCores issue DMAs
    # for their half; fall back to a single whole-array DMA if the batch does
    # not split evenly (no ragged-edge handling needed for a DMA copy).
    chunks = num_chunks if (b >= num_chunks and b % num_chunks == 0) else 1
    rows_per = b // chunks

    return pl.pallas_call(
        _make_hbm_copy_kernel(rows_per),
        out_shape=jax.ShapeDtypeStruct((b, flat), x.dtype),
        grid=(chunks,),
        # pl.ANY: kernel receives raw HBM refs; no auto-DMA, no VMEM staging.
        in_specs=[pl.BlockSpec(memory_space=pl.ANY)],
        out_specs=pl.BlockSpec(memory_space=pl.ANY),
        scratch_shapes=[pltpu.SemaphoreType.DMA(())],
        compiler_params=pltpu.CompilerParams(
            dimension_semantics=("parallel",)),
        cost_estimate=pl.CostEstimate(
            flops=0, transcendentals=0, bytes_accessed=2 * nbytes),
    )(x2)


if __name__ == "__main__":
    key = jax.random.PRNGKey(0)

    # Shapes consistent with a typical NCHW conv feature map.
    x = jax.random.normal(key, (2, 4, 16, 16), dtype=jnp.float32)

    # 1) Default path for a small input: zero-copy reshape (PyTorch .view).
    y_view = jax.block_until_ready(flatten_layer(x))
    assert y_view.shape == (2, 4 * 16 * 16), y_view.shape
    assert jnp.array_equal(y_view, x.reshape(2, -1)), "view-path mismatch"

    # 2) Force the DMA kernel path on the same small input.
    y = jax.block_until_ready(flatten_layer(x, min_kernel_bytes=0))
    assert jnp.array_equal(y, x.reshape(2, -1)), "kernel-path mismatch"

    # 3) A larger-ish case exercising the 2-chunk parallel DMA split.
    x2 = jax.random.normal(jax.random.PRNGKey(0), (16, 8, 16, 32),
                           dtype=jnp.float32)
    y2 = jax.block_until_ready(flatten_layer(x2, min_kernel_bytes=0))
    assert jnp.array_equal(y2, x2.reshape(16, -1)), "2-chunk case mismatch"

    # 4) Odd batch: single whole-array DMA fallback (no ragged hazards).
    x3 = jax.random.normal(jax.random.PRNGKey(0), (3, 4, 16, 16),
                           dtype=jnp.float32)
    y3 = jax.block_until_ready(flatten_layer(x3, min_kernel_bytes=0))
    assert jnp.array_equal(y3, x3.reshape(3, -1)), "odd-batch case mismatch"

    print("KERNEL_OK")
</pallas_src>

<mosaic_0001>
module attributes {stable_mosaic.version = 11 : i64} {
  func.func @kernel(%arg0: i32, %arg1: memref<2x1024xf32, #tpu.memory_space<any>>, %arg2: memref<2x1024xf32, #tpu.memory_space<any>>, %arg3: memref<!tpu.dma_semaphore, #tpu.memory_space<semaphore_mem>>) attributes {dimension_semantics = [#tpu.dimension_semantics<parallel>], iteration_bounds = array<i64: 2>, scalar_prefetch = 0 : i64, scratch_operands = 1 : i64, tpu.core_type = #tpu.core_type<tc>, window_params = [{}, {}]} {
    %c1_i32 = arith.constant 1 : i32
    %0 = arith.muli %arg0, %c1_i32 : i32
    %1 = tpu.assume_multiple %0, 1 : i32
    %c0_i32 = arith.constant 0 : i32
    %2 = tpu.memref_slice %arg1[%1, %c0_i32] : memref<2x1024xf32, #tpu.memory_space<any>> -> memref<1x1024xf32, #tpu.memory_space<any>>
    %c0_i32_0 = arith.constant 0 : i32
    %3 = tpu.memref_slice %arg2[%1, %c0_i32_0] : memref<2x1024xf32, #tpu.memory_space<any>> -> memref<1x1024xf32, #tpu.memory_space<any>>
    tpu.enqueue_dma source(%2 : memref<1x1024xf32, #tpu.memory_space<any>>) target(%3 : memref<1x1024xf32, #tpu.memory_space<any>>) target_semaphore(%arg3 : memref<!tpu.dma_semaphore, #tpu.memory_space<semaphore_mem>>)
    %c0_i32_1 = arith.constant 0 : i32
    %4 = tpu.memref_slice %arg1[%1, %c0_i32_1] : memref<2x1024xf32, #tpu.memory_space<any>> -> memref<1x1024xf32, #tpu.memory_space<any>>
    %c0_i32_2 = arith.constant 0 : i32
    %5 = tpu.memref_slice %arg2[%1, %c0_i32_2] : memref<2x1024xf32, #tpu.memory_space<any>> -> memref<1x1024xf32, #tpu.memory_space<any>>
    tpu.wait_dma2 semaphore(%arg3 : memref<!tpu.dma_semaphore, #tpu.memory_space<semaphore_mem>>) src(%4 : memref<1x1024xf32, #tpu.memory_space<any>>) dst(%5 : memref<1x1024xf32, #tpu.memory_space<any>>)
    return
  }
}

</mosaic_0001>

<bundles_post_ra>
// kernel: tpu_custom_call.1
= control target key start
LH: loop header
LB: loop body
LE: loop exit
PB: predicated region body
PF: predicated region fallthrough
CT: control target
= control target key end

     0   :  { %s85_s6 = smov 0   ;;  %s110_s0 = inlined_call_operand.hbm [shape: f32[2,1024], index: 0, kind: input, shape index: {}]   ;;  %s111_s1 = inlined_call_operand.hbm [shape: f32[2,1024], index: 1, kind: output, shape index: {}]  }
   0x1 LB: > { %s13_s7 = sshrl.u32 %s87_s6, 1  ;;  %s14_s8 = sand.u32 1, %s87_s6   ;;  %s87_s6 = sphi %s85_s6, %s11_s6  }
   0x2   : > { %s62_s9 = sshll.u32 %s13_s7, 4  ;;  %s89_s11 = smov 32  }
   0x3   : > { %s16_s10 = sadd.s32 %s62_s9, %s14_s8  ;;  %33 = sst [smem:[#allocation4]] %s89_s11 }
   0x4   : > { %s63_s12 = sshll.u32 %s16_s10, 4  ;;  %35 = sst [smem:[#allocation4 + $0x1]] %s89_s11 }
   0x5   : > { %s18_s15 = scalar_lea.hbm %s110_s0, %s63_s12  ;;  %s20_s18 = scalar_lea.hbm %s111_s1, %s63_s12 }
   0x6   : > { %s90_s19 = smov 1   ;;  %s91_s20 = smov [#allocation2]  }
   0x7   : > { %37 = sst [smem:[#allocation4 + $0x2]] %s90_s19  ;;  %s92_s21 = smov [#allocation3]  }
   0x8   : > { %s93_s22 = smov 0  }
   0x9   : > { %39 = dma.general %s18_s15, 128, %s20_s18, %s91_s20, %s92_s21, [#allocation4], %s93_s22, 0  }
   0xa   : > { %83 = dma.done.wait [#allocation2], 128 }
   0xb   : > { %84 = vsyncadd [#allocation2], 4294967168  ;;  %s11_s6 = sadd.s32 1, %s87_s6  }
   0xc   : > { %p8_p0 = scmp.ge.s32.totalorder %s11_s6, 2  }
   0xe   :  { %10 = sbr.rel (!%p8_p0) target bundleno = 1 (0x1), region = 23 }
  0x15   :  { %43 = vsyncmov [#allocation2] }
  0x18   :  { %s44_s23 = vpop.sfrf %43 }
  0x19   :  { %p65_p1 = scmp.ne.s32.totalorder %s44_s23, 0 }
  0x1b   :  { %48 = shalt.err (%p65_p1)  }

</bundles_post_ra>
